<compile_context>
chip_gen: v7x
topology: tpu7x:2x2x1
jax: 0.10.0
libtpu: 0.0.40
codegen_flags: <defaults>
</compile_context>

<pallas_src>
import functools
import math

import jax
import jax.numpy as jnp
from jax.experimental import pallas as pl
from jax.experimental.pallas import tpu as pltpu


# --------------------------------------------------------------------------------------
# Hardware / budget helpers
# --------------------------------------------------------------------------------------
@functools.lru_cache(maxsize=1)
def _vmem_capacity_bytes():
    # Per-generation VMEM capacity (128 MiB on v5e/v6e, 64 MiB per TensorCore on v7x).
    try:
        return int(pltpu.get_tpu_info().vmem_capacity_bytes)
    except Exception:
        return 64 * 1024 * 1024  # conservative (v7x-sized) fallback


def _vmem_limit_and_budget():
    cap = _vmem_capacity_bytes()
    limit = min(96 * 1024 * 1024, (cap * 3) // 4)  # 96 MiB on v5e/v6e, 48 MiB on v7x
    budget = (limit * 7) // 10                     # headroom for Mosaic internal scratch
    return limit, budget


def _sublane_align(dtype):
    # Native sublane packing: 8 rows for 32-bit, 16 for 16-bit, 32 for 8-bit dtypes.
    return max(8, 32 // jnp.dtype(dtype).itemsize)


# --------------------------------------------------------------------------------------
# Selection-matrix helpers (exact integer index arithmetic, PyTorch 'nearest' rule).
# --------------------------------------------------------------------------------------
def _nearest_src_index(out_size: int, in_size: int):
    # PyTorch mode='nearest': src = floor(dst * in/out).
    # TODO(synk): computed in exact integer arithmetic; PyTorch uses a float scale which
    # can differ for rare pathological size pairs.
    dst = jnp.arange(out_size, dtype=jnp.int32)
    return jnp.minimum((dst * in_size) // out_size, in_size - 1)


def _row_selection(in_size: int, out_size: int, dtype):
    # (out_size, in_size): M[o, i] = 1 iff i == src(o)
    src = _nearest_src_index(out_size, in_size)
    return (src[:, None] == jnp.arange(in_size, dtype=jnp.int32)[None, :]).astype(dtype)


def _col_selection(in_size: int, out_size: int, dtype):
    # (in_size, out_size): M[i, o] = 1 iff i == src(o)
    src = _nearest_src_index(out_size, in_size)
    return (jnp.arange(in_size, dtype=jnp.int32)[:, None] == src[None, :]).astype(dtype)


def _acc_dtype(x_dtype):
    d = jnp.dtype(x_dtype)
    if d in (jnp.dtype(jnp.bfloat16), jnp.dtype(jnp.float32)):
        return d
    # TODO(synk): integer inputs go through an exact-for-|x|<2^24 f32 one-hot matmul.
    return jnp.dtype(jnp.float32)


# --------------------------------------------------------------------------------------
# Kernels
# --------------------------------------------------------------------------------------
def _upsample_rows_kernel(g_ref, x_ref, o_ref, *, acc_dtype):
    # g_ref: (W_k, n_blk) one-hot selection block; x_ref: (r_blk, W_k); o_ref: (r_blk, n_blk).
    # One-hot K-reduction => exactly one non-zero term per output element, so accumulating
    # directly in the I/O dtype (e.g. bf16) is still exact; no f32 intermediate needed.
    x = x_ref[...].astype(g_ref.dtype)
    y = jnp.dot(x, g_ref[...], preferred_element_type=acc_dtype)
    o_ref[...] = y.astype(o_ref.dtype)


def _upsample_general_kernel(gh_ref, gwt_ref, x_ref, o_ref, *, acc_dtype, b_blk):
    # gh_ref: (H_out, H) row-selection; gwt_ref: (W, W_out) column-selection.
    # x_ref:  (b_blk, H, W); o_ref: (b_blk, H_out, W_out).  Many slices per grid step.
    gh = gh_ref[...]
    gwt = gwt_ref[...]

    def body(b, carry):
        xs = x_ref[b].astype(gh.dtype)                                         # (H, W)
        t = jnp.dot(gh, xs, preferred_element_type=acc_dtype)                  # (H_out, W)
        y = jnp.dot(t.astype(gwt.dtype), gwt, preferred_element_type=acc_dtype)
        o_ref[b] = y.astype(o_ref.dtype)
        return carry

    jax.lax.fori_loop(0, b_blk, body, 0, unroll=b_blk <= 8)


# --------------------------------------------------------------------------------------
# Module wrapper
# --------------------------------------------------------------------------------------
class UpSample:
    """Mirror of the PyTorch UpSample module (nearest-neighbor interpolation, NCHW)."""

    _MAT_RESIDENT_LIMIT = 8 * 1024 * 1024  # keep the resident selection-matrix block small

    def __init__(self, size=None, scale_factor=None, mode="nearest", align_corner=None):
        self.size = size
        self.scale_factor = scale_factor
        self.mode = mode
        self.align_corner = align_corner  # ignored for mode='nearest' (same as PyTorch)
        if mode != "nearest":
            # TODO(synk): only mode='nearest' is implemented; bilinear/bicubic would need
            # weighted (non 0/1) gather matrices built the same way.
            raise NotImplementedError("Only mode='nearest' is implemented.")

    def _out_hw(self, H, W):
        if self.size is not None:
            if isinstance(self.size, (tuple, list)):
                return int(self.size[0]), int(self.size[1])
            return int(self.size), int(self.size)
        sf = self.scale_factor
        if isinstance(sf, (tuple, list)):
            sh, sw = sf
        else:
            sh = sw = sf
        # PyTorch uses floor(input * scale_factor).
        return int(math.floor(H * float(sh))), int(math.floor(W * float(sw)))

    @functools.partial(jax.jit, static_argnums=0)
    def __call__(self, x):
        N, C, H, W = x.shape
        H_out, W_out = self._out_hw(H, W)
        if H_out % H == 0 and W_out % W == 0:
            return self._forward_integer(x, H_out, W_out)
        return self._forward_general(x, H_out, W_out)

    # ---------------- fast path: integer scale factors ----------------
    def _forward_integer(self, x, H_out, W_out):
        N, C, H, W = x.shape
        sh, sw = H_out // H, W_out // W
        R = N * C * H                  # flattened input rows
        Wo_f = sh * W_out              # fused output row width per input row

        acc_dtype = _acc_dtype(x.dtype)
        mat_dtype = acc_dtype
        in_isz = jnp.dtype(x.dtype).itemsize
        acc_isz = jnp.dtype(acc_dtype).itemsize
        mat_isz = jnp.dtype(mat_dtype).itemsize
        align = _sublane_align(x.dtype)
        vmem_limit, budget = _vmem_limit_and_budget()

        # Lane-dense folding: if the fused row is narrow, fold g consecutive input rows
        # into one output row via a block-diagonal matrix so stores are unmasked vst's.
        g = 1
        while (g * Wo_f < 512 and R % (2 * g) == 0 and 2 * g * W <= 512
               and (2 * g * W) * (2 * g * Wo_f) * mat_isz <= 2 * 1024 * 1024):
            g *= 2
        R_f, W_k, Wo_k = R // g, g * W, g * Wo_f

        # Fused selection matrix (exact 0/1): W expansion + sh-fold replication, block-diag.
        gw = _col_selection(W, W_out, mat_dtype)            # (W, W_out)
        grow = jnp.tile(gw, (1, sh)) if sh > 1 else gw      # (W, Wo_f)
        gfused = jnp.kron(jnp.eye(g, dtype=mat_dtype), grow) if g > 1 else grow

        # Width tiling: bound the resident matrix block so huge W / scales neither blow
        # the VMEM limit nor collapse the row block.
        mat_bytes_full = W_k * Wo_k * mat_isz
        if mat_bytes_full <= self._MAT_RESIDENT_LIMIT:
            n_blk, grid_w = Wo_k, 1
            mat_vmem = mat_bytes_full                       # single-buffered (constant idx)
        else:
            n_blk = max(128, (self._MAT_RESIDENT_LIMIT // (W_k * mat_isz)) // 128 * 128)
            grid_w = pl.cdiv(Wo_k, n_blk)
            mat_vmem = 2 * W_k * n_blk * mat_isz            # double-buffered (idx varies)

        # Row block from the VMEM budget (double-buffered in/out blocks); cap at ceil(R/2)
        # so megacore parts (v7x) shard across both TensorCores; round to sublane packing.
        row_bytes = 2 * W_k * in_isz + 2 * n_blk * in_isz
        if acc_dtype != jnp.dtype(x.dtype):
            row_bytes += n_blk * acc_isz                    # f32 intermediate (int inputs)
        avail = max(budget - mat_vmem, 1 * 1024 * 1024)
        if R_f <= align:
            r_blk = R_f
        else:
            r_blk = max(avail // row_bytes, align)
            half = -(-R_f // 2)
            half = -(-half // align) * align
            r_blk = min(r_blk, half)
            r_blk = max((r_blk // align) * align, align)
        grid_r = pl.cdiv(R_f, r_blk)

        if grid_w == 1:
            mat_spec = pl.BlockSpec((W_k, n_blk), lambda j, i: (0, j),
                                    pipeline_mode=pl.Buffered(1))  # constant -> 1 buffer
        else:
            mat_spec = pl.BlockSpec((W_k, n_blk), lambda j, i: (0, j))
        # TODO(synk): optionally pl.Buffered(3) on the x spec if a profile shows exposed
        # input DMA for very small W.
        x_spec = pl.BlockSpec((r_blk, W_k), lambda j, i: (i, 0))
        out_spec = pl.BlockSpec((r_blk, n_blk), lambda j, i: (i, j))

        cost = pl.CostEstimate(
            flops=2 * R_f * W_k * Wo_k,
            transcendentals=0,
            bytes_accessed=R_f * W_k * in_isz + R_f * Wo_k * in_isz + mat_bytes_full,
        )

        out2 = pl.pallas_call(
            functools.partial(_upsample_rows_kernel, acc_dtype=acc_dtype),
            out_shape=jax.ShapeDtypeStruct((R_f, Wo_k), x.dtype),
            grid=(grid_w, grid_r),
            in_specs=[mat_spec, x_spec],
            out_specs=out_spec,
            compiler_params=pltpu.CompilerParams(
                dimension_semantics=("parallel", "parallel"),
                vmem_limit_bytes=vmem_limit,
            ),
            cost_estimate=cost,
        )(gfused, x.reshape(R_f, W_k))

        # (R_f, g*sh*W_out) is byte-identical to (N, C, H_out, W_out): free reshape.
        return out2.reshape(N, C, H_out, W_out)

    # ---------------- general path: arbitrary size / non-integer scale ----------------
    def _forward_general(self, x, H_out, W_out):
        N, C, H, W = x.shape
        B = N * C
        acc_dtype = _acc_dtype(x.dtype)
        mat_dtype = acc_dtype
        in_isz = jnp.dtype(x.dtype).itemsize
        acc_isz = jnp.dtype(acc_dtype).itemsize
        mat_isz = jnp.dtype(mat_dtype).itemsize
        vmem_limit, budget = _vmem_limit_and_budget()

        gh = _row_selection(H, H_out, mat_dtype)    # (H_out, H)
        gwt = _col_selection(W, W_out, mat_dtype)   # (W, W_out)

        # Block many (n, c) slices per grid step to amortize per-step overhead;
        # keep >= 2 grid steps so megacore parts use both TensorCores.
        per_slice = (2 * H * W * in_isz + 2 * H_out * W_out * in_isz
                     + H_out * W * acc_isz + H_out * W_out * acc_isz)
        mat_bytes = (H_out * H + W * W_out) * mat_isz
        avail = max(budget - mat_bytes, 1 * 1024 * 1024)
        b_blk = max(1, avail // per_slice)
        if B > 1:
            b_blk = min(b_blk, -(-B // 2))
        b_blk = min(b_blk, B)
        grid_b = pl.cdiv(B, b_blk)

        cost = pl.CostEstimate(
            flops=2 * B * (H_out * H * W + H_out * W * W_out),
            transcendentals=0,
            bytes_accessed=B * H * W * in_isz + B * H_out * W_out * in_isz + mat_bytes,
        )

        out = pl.pallas_call(
            functools.partial(_upsample_general_kernel, acc_dtype=acc_dtype, b_blk=b_blk),
            out_shape=jax.ShapeDtypeStruct((B, H_out, W_out), x.dtype),
            grid=(grid_b,),
            in_specs=[
                pl.BlockSpec((H_out, H), lambda b: (0, 0), pipeline_mode=pl.Buffered(1)),
                pl.BlockSpec((W, W_out), lambda b: (0, 0), pipeline_mode=pl.Buffered(1)),
                pl.BlockSpec((b_blk, H, W), lambda b: (b, 0, 0)),
            ],
            out_specs=pl.BlockSpec((b_blk, H_out, W_out), lambda b: (b, 0, 0)),
            compiler_params=pltpu.CompilerParams(
                dimension_semantics=("parallel",),
                vmem_limit_bytes=vmem_limit,
            ),
            cost_estimate=cost,
        )(gh, gwt, x.reshape(B, H, W))
        return out.reshape(N, C, H_out, W_out)


# --------------------------------------------------------------------------------------
# Demo / self-test
# --------------------------------------------------------------------------------------
if __name__ == "__main__":
    key = jax.random.PRNGKey(0)
    x = jax.random.normal(key, (2, 4, 16, 16), dtype=jnp.float32)

    # Fast path, f32: integer scale factor 2 (exercises lane-dense row folding).
    up2 = UpSample(scale_factor=2, mode="nearest")
    y = jax.block_until_ready(up2(x))
    expected = jnp.repeat(jnp.repeat(x, 2, axis=2), 2, axis=3)
    assert y.shape == (2, 4, 32, 32), y.shape
    assert y.dtype == x.dtype, y.dtype
    assert jnp.array_equal(y, expected), "mismatch (fast path, f32)"

    # Fast path, bf16: exercises direct bf16 accumulation (exact for one-hot selection).
    xb = x.astype(jnp.bfloat16)
    yb = jax.block_until_ready(up2(xb))
    assert yb.dtype == jnp.bfloat16
    assert jnp.array_equal(yb, jnp.repeat(jnp.repeat(xb, 2, axis=2), 2, axis=3)), \
        "mismatch (fast path, bf16)"

    # Fast path, wide W: exercises the width-tiled resident-matrix case.
    xw = jax.random.normal(jax.random.PRNGKey(1), (1, 2, 8, 1024), dtype=jnp.float32)
    yw = jax.block_until_ready(up2(xw))
    assert yw.shape == (1, 2, 16, 2048), yw.shape
    assert jnp.array_equal(yw, jnp.repeat(jnp.repeat(xw, 2, axis=2), 2, axis=3)), \
        "mismatch (fast path, width-tiled)"

    # General path: explicit (non-integer-ratio) output size.
    up_g = UpSample(size=(24, 20), mode="nearest")
    yg = jax.block_until_ready(up_g(x))
    src_h = (jnp.arange(24, dtype=jnp.int32) * 16) // 24
    src_w = (jnp.arange(20, dtype=jnp.int32) * 16) // 20
    expected_g = x[:, :, src_h, :][:, :, :, src_w]
    assert yg.shape == (2, 4, 24, 20), yg.shape
    assert jnp.array_equal(yg, expected_g), "mismatch (general path)"

    print("KERNEL_OK")
</pallas_src>

<mosaic_0001>
module attributes {stable_mosaic.version = 11 : i64} {
  func.func @_upsample_rows_kernel(%arg0: i32, %arg1: i32, %arg2: memref<128x512xf32, #tpu.memory_space<vmem>>, %arg3: memref<8x128xf32, #tpu.memory_space<vmem>>, %arg4: memref<8x512xf32, #tpu.memory_space<vmem>>) attributes {dimension_semantics = [#tpu.dimension_semantics<parallel>, #tpu.dimension_semantics<parallel>], iteration_bounds = array<i64: 1, 2>, scalar_prefetch = 0 : i64, scratch_operands = 0 : i64, tpu.core_type = #tpu.core_type<tc>, window_params = [{pipeline_mode = #tpu.pipeline_mode<synchronous>, transform_indices = @transform_0, window_bounds = array<i64: 128, 512>}, {transform_indices = @transform_1, window_bounds = array<i64: 8, 128>}, {transform_indices = @transform_2, window_bounds = array<i64: 8, 512>}]} {
    %c0 = arith.constant 0 : index
    %c0_0 = arith.constant 0 : index
    %0 = vector.load %arg3[%c0, %c0_0] : memref<8x128xf32, #tpu.memory_space<vmem>>, vector<8x128xf32>
    %c0_1 = arith.constant 0 : index
    %c0_2 = arith.constant 0 : index
    %1 = vector.load %arg2[%c0_1, %c0_2] : memref<128x512xf32, #tpu.memory_space<vmem>>, vector<128x512xf32>
    %cst = arith.constant dense<0.000000e+00> : vector<8x512xf32>
    %2 = tpu.matmul %0, %1, %cst {dimension_numbers = #tpu.dot_dimension_numbers<[1], [0], [0], [1], [0, 0, 1, 1], [], []>} : vector<8x128xf32>, vector<128x512xf32>, vector<8x512xf32> -> vector<8x512xf32>
    %c0_3 = arith.constant 0 : index
    %c0_4 = arith.constant 0 : index
    %3 = vector.load %arg4[%c0_3, %c0_4] : memref<8x512xf32, #tpu.memory_space<vmem>>, vector<8x512xf32>
    tpu.vector_store %arg4[%c0_3, %c0_4], %2 {strides = array<i32>} : memref<8x512xf32, #tpu.memory_space<vmem>>, vector<8x512xf32>,
    return
  }
  func.func @transform_0(%arg0: i32, %arg1: i32) -> (i32, i32) {
    %c0_i32 = arith.constant 0 : i32
    %c0_i32_0 = arith.constant 0 : i32
    return %c0_i32, %arg0 : i32, i32
  }
  func.func @transform_1(%arg0: i32, %arg1: i32) -> (i32, i32) {
    %c0_i32 = arith.constant 0 : i32
    %c0_i32_0 = arith.constant 0 : i32
    return %arg1, %c0_i32 : i32, i32
  }
  func.func @transform_2(%arg0: i32, %arg1: i32) -> (i32, i32) {
    %c0_i32 = arith.constant 0 : i32
    return %arg1, %arg0 : i32, i32
  }
}

</mosaic_0001>

<bundles_post_ra>
// kernel: a_call__.1
= control target key start
LH: loop header
LB: loop body
LE: loop exit
PB: predicated region body
PF: predicated region fallthrough
CT: control target
= control target key end

     0   :  { %s634_s9 = smov 0   ;;  %s636_s10 = smov 0   ;;  %s869_s0 = inlined_call_operand.vmem [shape: f32[128,512], index: 0, kind: input, shape index: {}]   ;;  %s870_s1 = inlined_call_operand.vmem [shape: f32[16,128], index: 1, kind: input, shape index: {}]   ;;  %s871_s2 = inlined_call_operand.vmem [shape: f32[16,512], index: 2, kind: output, shape index: {}]  }
   0x1   :  { %s638_s11 = smov 0  }
   0x2 LB: > { %s21_s12 = sadd.s32 1, %s612_s10  ;;  %p498_p0 = scmp.ge.s32.totalorder %s616_s11, 1  ;;  %s616_s11 = sphi %s638_s11, %s12_s11   ;;  %s612_s10 = sphi %s636_s10, %s873_s10   ;;  %s608_s9 = sphi %s634_s9, %s872_s9  }
   0x3   : > { %p22_p1 = scmp.ge.s32.totalorder %s21_s12, 2  ;;  %p136_p2 = scmp.lt.s32.totalorder %s616_s11, 3 }
   0x5   : > { %s875_s12 = smov (%p22_p1, %s21_s12), 0  ;;  %p137_p3 = pnand %p498_p0, %p136_p2 }
   0x6   : > { %v188_v0 = vld [vmem:[%s869_s0 + $0x8] sm:$0xff] (!%p137_p3)  ;;  %v190_v2 = vld [vmem:[%s869_s0 + $0x18] sm:$0xff] (!%p137_p3)  ;;  %v187_v5 = vld [vmem:[%s869_s0] sm:$0xff] (!%p137_p3)  ;;  %v618_v7 = vmov (!%p137_p3), 0.0   ;;  %p172_p4 = scmp.lt.s32.totalorder (!%p137_p3), %s608_s9, 1 }
   0x7   : > { %140 = sbr.rel (%p137_p3) target bundleno = 257 (0x101), region = 28  ;;  %v192_v1 = vld [vmem:[%s869_s0 + $0x28] sm:$0xff] (!%p137_p3)  ;;  %v194_v4 = vld [vmem:[%s869_s0 + $0x38] sm:$0xff] (!%p137_p3)  ;;  %v191_v6 = vld [vmem:[%s869_s0 + $0x20] sm:$0xff] (!%p137_p3)  ;;  %315 = vmatprep.mubr.f32.mxu0 (!%p137_p3), %v618_v7  ;;  %386 = vmatprep.mubr.f32.mxu1 (!%p137_p3), %v618_v7 }
   0x8   : > { %v505_v3 = vpack.c.bf16 (!%p137_p3), %v192_v1, %v188_v0  ;;  %v537_v8 = vpack.c.bf16 (!%p137_p3), %v194_v4, %v190_v2  ;;  %v507_v9 = vpack.c.bf16 (!%p137_p3), %v191_v6, %v187_v5  ;;  %v189_v10 = vld [vmem:[%s869_s0 + $0x10] sm:$0xff] (!%p137_p3)  ;;  %v196_v12 = vld [vmem:[%s869_s0 + $0x48] sm:$0xff] (!%p137_p3)  ;;  %v198_v15 = vld [vmem:[%s869_s0 + $0x58] sm:$0xff] (!%p137_p3) }
   0x9   : > { %v193_v11 = vld [vmem:[%s869_s0 + $0x30] sm:$0xff] (!%p137_p3)  ;;  %v200_v14 = vld [vmem:[%s869_s0 + $0x68] sm:$0xff] (!%p137_p3)  ;;  %v202_v16 = vld [vmem:[%s869_s0 + $0x78] sm:$0xff] (!%p137_p3) }
   0xa   : > { %506 = vmatprep.subr.bf16.mxu0 (!%p137_p3), %v505_v3  ;;  %v539_v13 = vpack.c.bf16 (!%p137_p3), %v193_v11, %v189_v10  ;;  %538 = vmatprep.subr.bf16.mxu1 (!%p137_p3), %v537_v8  ;;  %v509_v17 = vpack.c.bf16 (!%p137_p3), %v200_v14, %v196_v12  ;;  %v541_v18 = vpack.c.bf16 (!%p137_p3), %v202_v16, %v198_v15  ;;  %v195_v19 = vld [vmem:[%s869_s0 + $0x40] sm:$0xff] (!%p137_p3)  ;;  %v197_v21 = vld [vmem:[%s869_s0 + $0x50] sm:$0xff] (!%p137_p3)  ;;  %v204_v24 = vld [vmem:[%s869_s0 + $0x88] sm:$0xff] (!%p137_p3) }
   0xb   : > { %508 = vmatpush1.bf16.msra.mxu0 (!%p137_p3), %v507_v9  ;;  %v199_v20 = vld [vmem:[%s869_s0 + $0x60] sm:$0xff] (!%p137_p3)  ;;  %v201_v23 = vld [vmem:[%s869_s0 + $0x70] sm:$0xff] (!%p137_p3)  ;;  %v208_v25 = vld [vmem:[%s869_s0 + $0xa8] sm:$0xff] (!%p137_p3) }
   0xc   : > { %540 = vmatpush1.bf16.msra.mxu1 (!%p137_p3), %v539_v13  ;;  %v511_v22 = vpack.c.bf16 (!%p137_p3), %v199_v20, %v195_v19  ;;  %510 = vmatprep.subr.bf16.mxu0 (!%p137_p3), %v509_v17  ;;  %v543_v26 = vpack.c.bf16 (!%p137_p3), %v201_v23, %v197_v21  ;;  %v513_v27 = vpack.c.bf16 (!%p137_p3), %v208_v25, %v204_v24  ;;  %v206_v28 = vld [vmem:[%s869_s0 + $0x98] sm:$0xff] (!%p137_p3)  ;;  %v203_v30 = vld [vmem:[%s869_s0 + $0x80] sm:$0xff] (!%p137_p3)  ;;  %v205_v33 = vld [vmem:[%s869_s0 + $0x90] sm:$0xff] (!%p137_p3) }
   0xd   : > { %542 = vmatprep.subr.bf16.mxu1 (!%p137_p3), %v541_v18  ;;  %v210_v29 = vld [vmem:[%s869_s0 + $0xb8] sm:$0xff] (!%p137_p3)  ;;  %v207_v32 = vld [vmem:[%s869_s0 + $0xa0] sm:$0xff] (!%p137_p3)  ;;  %v209_v34 = vld [vmem:[%s869_s0 + $0xb0] sm:$0xff] (!%p137_p3) }
   0xe   : > { %v545_v31 = vpack.c.bf16 %v210_v29, %v206_v28  ;;  %v515_v35 = vpack.c.bf16 %v207_v32, %v203_v30  ;;  %v212_v36 = vld [vmem:[%s869_s0 + $0xc8] sm:$0xff]  ;;  %v214_v38 = vld [vmem:[%s869_s0 + $0xd8] sm:$0xff]  ;;  %v547_v39 = vpack.c.bf16 %v209_v34, %v205_v33  ;;  %v211_v42 = vld [vmem:[%s869_s0 + $0xc0] sm:$0xff]  ;;  %s877_s9 = smov (!%p172_p4, %s608_s9), 1 }
   0xf   : > { %512 = vmatpush1.bf16.msra.mxu0 %v511_v22  ;;  %v216_v37 = vld [vmem:[%s869_s0 + $0xe8] sm:$0xff]  ;;  %v218_v41 = vld [vmem:[%s869_s0 + $0xf8] sm:$0xff]  ;;  %v215_v43 = vld [vmem:[%s869_s0 + $0xe0] sm:$0xff]  ;;  %s499_s21 = sshll.u32 %s877_s9, 3  ;;  %s504_s25 = sshll.u32 %s877_s9, 5 }
  0x10   : > { %544 = vmatpush1.bf16.msra.mxu1 %v543_v26  ;;  %514 = vmatprep.subr.bf16.mxu0 %v513_v27  ;;  %v517_v40 = vpack.c.bf16 %v216_v37, %v212_v36  ;;  %v549_v44 = vpack.c.bf16 %v218_v41, %v214_v38  ;;  %v213_v45 = vld [vmem:[%s869_s0 + $0xd0] sm:$0xff]  ;;  %v220_v47 = vld [vmem:[%s869_s0 + $0x108] sm:$0xff]  ;;  %v222_v49 = vld [vmem:[%s869_s0 + $0x118] sm:$0xff]  ;;  %v519_v51 = vpack.c.bf16 %v215_v43, %v211_v42  ;;  %s175_s24 = scalar_lea.vmem %s870_s1, %s499_s21  ;;  %s184_s28 = scalar_lea.vmem %s871_s2, %s504_s25 }
  0x11   : > { %546 = vmatprep.subr.bf16.mxu1 %v545_v31  ;;  %v217_v46 = vld [vmem:[%s869_s0 + $0xf0] sm:$0xff]  ;;  %v224_v48 = vld [vmem:[%s869_s0 + $0x128] sm:$0xff]  ;;  %v226_v50 = vld [vmem:[%s869_s0 + $0x138] sm:$0xff] }
  0x12   : > { %v551_v52 = vpack.c.bf16 %v217_v46, %v213_v45  ;;  %v521_v53 = vpack.c.bf16 %v224_v48, %v220_v47  ;;  %v219_v54 = vld [vmem:[%s869_s0 + $0x100] sm:$0xff]  ;;  %v221_v56 = vld [vmem:[%s869_s0 + $0x110] sm:$0xff]  ;;  %v553_v57 = vpack.c.bf16 %v226_v50, %v222_v49  ;;  %v228_v59 = vld [vmem:[%s869_s0 + $0x148] sm:$0xff] }
  0x13   : > { %516 = vmatpush1.bf16.msra.mxu0 %v515_v35  ;;  %v223_v55 = vld [vmem:[%s869_s0 + $0x120] sm:$0xff]  ;;  %v225_v58 = vld [vmem:[%s869_s0 + $0x130] sm:$0xff]  ;;  %v232_v60 = vld [vmem:[%s869_s0 + $0x168] sm:$0xff] }
  0x14   : > { %548 = vmatpush1.bf16.msra.mxu1 %v547_v39  ;;  %518 = vmatprep.subr.bf16.mxu0 %v517_v40  ;;  %v230_v61 = vld [vmem:[%s869_s0 + $0x158] sm:$0xff]  ;;  %v523_v63 = vpack.c.bf16 %v223_v55, %v219_v54  ;;  %v555_v0 = vpack.c.bf16 %v225_v58, %v221_v56  ;;  %v525_v1 = vpack.c.bf16 %v232_v60, %v228_v59  ;;  %v227_v2 = vld [vmem:[%s869_s0 + $0x140] sm:$0xff]  ;;  %v229_v4 = vld [vmem:[%s869_s0 + $0x150] sm:$0xff] }
  0x15   : > { %550 = vmatprep.subr.bf16.mxu1 %v549_v44  ;;  %v234_v62 = vld [vmem:[%s869_s0 + $0x178] sm:$0xff]  ;;  %v231_v3 = vld [vmem:[%s869_s0 + $0x160] sm:$0xff]  ;;  %v233_v6 = vld [vmem:[%s869_s0 + $0x170] sm:$0xff] }
  0x16   : > { %v557_v5 = vpack.c.bf16 %v234_v62, %v230_v61  ;;  %v236_v7 = vld [vmem:[%s869_s0 + $0x188] sm:$0xff]  ;;  %v238_v9 = vld [vmem:[%s869_s0 + $0x198] sm:$0xff]  ;;  %v527_v11 = vpack.c.bf16 %v231_v3, %v227_v2  ;;  %v559_v12 = vpack.c.bf16 %v233_v6, %v229_v4  ;;  %v235_v14 = vld [vmem:[%s869_s0 + $0x180] sm:$0xff] }
  0x17   : > { %520 = vmatpush1.bf16.msra.mxu0 %v519_v51  ;;  %v240_v8 = vld [vmem:[%s869_s0 + $0x1a8] sm:$0xff]  ;;  %v242_v10 = vld [vmem:[%s869_s0 + $0x1b8] sm:$0xff]  ;;  %v239_v15 = vld [vmem:[%s869_s0 + $0x1a0] sm:$0xff] }
  0x18   : > { %552 = vmatpush1.bf16.msra.mxu1 %v551_v52  ;;  %522 = vmatprep.subr.bf16.mxu0 %v521_v53  ;;  %v529_v13 = vpack.c.bf16 %v240_v8, %v236_v7  ;;  %v237_v16 = vld [vmem:[%s869_s0 + $0x190] sm:$0xff]  ;;  %v561_v17 = vpack.c.bf16 %v242_v10, %v238_v9  ;;  %v244_v19 = vld [vmem:[%s869_s0 + $0x1c8] sm:$0xff]  ;;  %v246_v21 = vld [vmem:[%s869_s0 + $0x1d8] sm:$0xff]  ;;  %v531_v23 = vpack.c.bf16 %v239_v15, %v235_v14 }
  0x19   : > { %554 = vmatprep.subr.bf16.mxu1 %v553_v57  ;;  %v241_v18 = vld [vmem:[%s869_s0 + $0x1b0] sm:$0xff]  ;;  %v248_v20 = vld [vmem:[%s869_s0 + $0x1e8] sm:$0xff]  ;;  %v250_v22 = vld [vmem:[%s869_s0 + $0x1f8] sm:$0xff] }
  0x1a   : > { %v563_v24 = vpack.c.bf16 %v241_v18, %v237_v16  ;;  %v533_v25 = vpack.c.bf16 %v248_v20, %v244_v19  ;;  %v243_v26 = vld [vmem:[%s869_s0 + $0x1c0] sm:$0xff]  ;;  %v565_v28 = vpack.c.bf16 %v250_v22, %v246_v21  ;;  %v245_v29 = vld [vmem:[%s869_s0 + $0x1d0] sm:$0xff] }
  0x1b   : > { %524 = vmatpush1.bf16.msra.mxu0 %v523_v63  ;;  %v247_v27 = vld [vmem:[%s869_s0 + $0x1e0] sm:$0xff]  ;;  %v249_v30 = vld [vmem:[%s869_s0 + $0x1f0] sm:$0xff] }
  0x1c   : > { %556 = vmatpush1.bf16.msra.mxu1 %v555_v0  ;;  %526 = vmatprep.subr.bf16.mxu0 %v525_v1  ;;  %v535_v31 = vpack.c.bf16 %v247_v27, %v243_v26  ;;  %v567_v32 = vpack.c.bf16 %v249_v30, %v245_v29  ;;  %v186_v33 = vld [vmem:[%s175_s24] sm:$0xff] }
  0x1d   : > { %558 = vmatprep.subr.bf16.mxu1 %v557_v5 }
  0x1f   : > { %528 = vmatpush1.bf16.msra.mxu0 %v527_v11 }
  0x20   : > { %560 = vmatpush1.bf16.msra.mxu1 %v559_v12  ;;  %530 = vmatprep.subr.bf16.mxu0 %v529_v13 }
  0x21   : > { %562 = vmatprep.subr.bf16.mxu1 %v561_v17 }
  0x23   : > { %532 = vmatpush1.bf16.msra.mxu0 %v531_v23 }
  0x24   : > { %564 = vmatpush1.bf16.msra.mxu1 %v563_v24  ;;  %534 = vmatprep.subr.bf16.mxu0 %v533_v25 }
  0x25   : > { %566 = vmatprep.subr.bf16.mxu1 %v565_v28 }
  0x27   : > { %536 = vmatpush1.bf16.msra.mxu0 %v535_v31 }
  0x28   : > { %568 = vmatpush1.bf16.msra.mxu1 %v567_v32 }
  0x2a   : > { %316 = vmatmul.mubr.f32.vlgmr.msra.gmra.mrb[0].mxu0 %v186_v33 }
  0x2b   : > { %387 = vmatmul.mubr.f32.vlgmr.msra.gmra.mrb[0].mxu1 %v186_v33 }
  0xfd   : > { %v317_v34 = vpop.f32.mrb[0].mxu0 }
  0xfe   : > { %393 = vst [vmem:[%s184_s28] sm:$0xff] %v317_v34  ;;  %v388_v35 = vpop.f32.mrb[0].mxu1  ;;  %v319_v36 = vpop.f32.mrb[1].mxu0 }
  0xff   : > { %395 = vst [vmem:[%s184_s28 + $0x10] sm:$0xff] %v388_v35  ;;  %394 = vst [vmem:[%s184_s28 + $0x8] sm:$0xff] %v319_v36  ;;  %v390_v37 = vpop.f32.mrb[1].mxu1 }
 0x100   : > { %396 = vst [vmem:[%s184_s28 + $0x18] sm:$0xff] %v390_v37 }
 0x101 PF: > { %s12_s11 = sadd.s32 1, %s616_s11   ;;  %s872_s9 = smov %s612_s10 }
 0x102   : > { %p9_p5 = scmp.ge.s32.totalorder %s12_s11, 4   ;;  %s873_s10 = smov %s875_s12 }
 0x104   :  { %11 = sbr.rel (!%p9_p5) target bundleno = 2 (0x2), region = 61 }

</bundles_post_ra>
